<compile_context>
chip_gen: v5e
topology: v5e:2x2
jax: 0.10.0
libtpu: 0.0.40
codegen_flags: <defaults>
</compile_context>

<pallas_src>
import functools

import jax
import jax.numpy as jnp
from jax.experimental import pallas as pl
from jax.experimental.pallas import tpu as pltpu

_LANE = 128
_SUBLANE = 8


def _round_up(x, m):
    return ((x + m - 1) // m) * m


def _vmem_budget_bytes():
    """Bytes of VMEM allowed for the double-buffered input pipeline."""
    try:
        cap = pltpu.get_tpu_info().vmem_capacity_bytes
    except Exception:
        cap = 64 * 1024 * 1024  # conservative: v7x per-TensorCore physical VMEM
    # ~3/8 of physical VMEM for pipeline buffers, capped for v5e/v6e too.
    return int(min(cap * 3 // 8, 48 * 1024 * 1024))


def _pick_block_rows(n_rows, bytes_per_row, budget, cap_rows=4096):
    """Largest multiple-of-8 row tile that fits the pipeline budget."""
    br = budget // max(bytes_per_row, 1)
    br = min(br, cap_rows, _round_up(n_rows, _SUBLANE))
    br = max(_SUBLANE, (br // _SUBLANE) * _SUBLANE)
    return int(br)


def _lane_dense_view(t, p, n, d):
    """For the 'none' path: present a lane-dense (multiple-of-128) last dim."""
    if d % _LANE == 0:
        return t, p, (n, d)
    total = n * d
    if total % _LANE == 0:
        cols = _LANE
        while total % (cols * 2) == 0 and cols * 2 <= 4096:
            cols *= 2
        rows = total // cols
        return t.reshape(rows, cols), p.reshape(rows, cols), (rows, cols)
    # TODO(synk): D not lane-dense and total not reshapeable -> masked stores.
    return t, p, (n, d)


# ------------------------------ kernels -------------------------------------


def _pointwise_reduce_kernel(true_ref, pred_ref, out_ref, acc_ref, *,
                             n_total, block_rows, reduction, mask_tail):
    """Grid = (D tiles [parallel], N tiles [arbitrary, reduction — last])."""
    i = pl.program_id(1)  # row/reduction axis

    @pl.when(i == 0)
    def _():
        acc_ref[...] = jnp.zeros_like(acc_ref)

    t = true_ref[...].astype(jnp.float32)
    p = pred_ref[...].astype(jnp.float32)
    diff = t - p
    loss = diff * diff  # point_wise hot path (squared error)

    if mask_tail:
        # Ragged final row block: zero out rows >= n_total before accumulating.
        row = jax.lax.broadcasted_iota(jnp.int32, loss.shape, 0) + i * block_rows
        loss = jnp.where(row < n_total, loss, 0.0)

    # VALU-only per-step accumulation: fold the row tile into an (8, tile_d)
    # vreg-shaped partial sum (no cross-sublane movement here).
    acc_ref[...] += loss.reshape(block_rows // _SUBLANE, _SUBLANE,
                                 loss.shape[-1]).sum(axis=0)

    @pl.when(i == pl.num_programs(1) - 1)
    def _():
        # Single 8 -> 1 sublane (XLU) reduce, once per output tile.
        acc = acc_ref[...].sum(axis=0, keepdims=True)
        if reduction == "mean":
            acc = acc * (1.0 / float(n_total))
        out_ref[...] = acc


def _pointwise_none_kernel(true_ref, pred_ref, out_ref):
    t = true_ref[...].astype(jnp.float32)
    p = pred_ref[...].astype(jnp.float32)
    diff = t - p
    out_ref[...] = diff * diff


# ------------------------------ wrapper --------------------------------------


def point_wise_loss(true_relevance, predicted_relevance, *,
                    reduce=True, reduction="mean", block_rows=None):
    """Pallas implementation of PointWiseLoss.forward (squared-error point_wise)."""
    assert reduction in ("none", "mean", "sum")
    do_reduce = reduce and reduction != "none"

    N, D = true_relevance.shape
    budget = _vmem_budget_bytes()

    if not do_reduce:
        t2, p2, (rows, cols) = _lane_dense_view(
            true_relevance, predicted_relevance, N, D)
        bytes_per_row = 3 * 2 * cols * 4  # 3 arrays x double buffer x f32
        br = (block_rows if block_rows is not None
              else _pick_block_rows(rows, bytes_per_row, budget))
        br = max(_SUBLANE, _round_up(br, _SUBLANE))
        grid = (pl.cdiv(rows, br),)
        spec = pl.BlockSpec((br, cols), lambda i: (i, 0))
        vmem_limit = int(min(max(bytes_per_row * br + (4 << 20), 16 << 20),
                             64 << 20))
        out = pl.pallas_call(
            _pointwise_none_kernel,
            out_shape=jax.ShapeDtypeStruct((rows, cols), jnp.float32),
            grid_spec=pltpu.PrefetchScalarGridSpec(
                num_scalar_prefetch=0,
                grid=grid,
                in_specs=[spec, spec],
                out_specs=pl.BlockSpec((br, cols), lambda i: (i, 0)),
            ),
            compiler_params=pltpu.CompilerParams(
                dimension_semantics=("parallel",),
                vmem_limit_bytes=vmem_limit),
            cost_estimate=pl.CostEstimate(
                flops=2 * N * D, transcendentals=0,
                bytes_accessed=3 * N * D * 4),
        )(t2, p2)
        return out.reshape(N, D)

    # Reduce path: sum over dim 0 (optionally / N).
    # Lane (D) split provides a "parallel" grid axis (both TensorCores on v7x).
    if D % _LANE == 0 and D > 512:
        tile_d = 512 if D % 512 == 0 else (256 if D % 256 == 0 else _LANE)
    else:
        tile_d = D
    n_d_blocks = pl.cdiv(D, tile_d)

    bytes_per_row = 2 * 2 * tile_d * 4  # 2 inputs x double buffer x f32
    br = (block_rows if block_rows is not None
          else _pick_block_rows(N, bytes_per_row, budget))
    br = max(_SUBLANE, _round_up(br, _SUBLANE))
    mask_tail = (N % br) != 0
    grid = (n_d_blocks, pl.cdiv(N, br))

    in_spec = pl.BlockSpec((br, tile_d), lambda j, i: (i, j))
    out_spec = pl.BlockSpec((1, tile_d), lambda j, i: (0, j))

    scratch_bytes = _SUBLANE * tile_d * 4
    vmem_limit = int(min(max(bytes_per_row * br + scratch_bytes + (4 << 20),
                             16 << 20), 64 << 20))

    kernel = functools.partial(
        _pointwise_reduce_kernel, n_total=N, block_rows=br,
        reduction=reduction, mask_tail=mask_tail)
    out = pl.pallas_call(
        kernel,
        out_shape=jax.ShapeDtypeStruct((1, D), jnp.float32),
        grid_spec=pltpu.PrefetchScalarGridSpec(
            num_scalar_prefetch=0,
            grid=grid,
            in_specs=[in_spec, in_spec],
            out_specs=out_spec,
            scratch_shapes=[pltpu.VMEM((_SUBLANE, tile_d), jnp.float32)],
        ),
        compiler_params=pltpu.CompilerParams(
            dimension_semantics=("parallel", "arbitrary"),
            vmem_limit_bytes=vmem_limit),
        cost_estimate=pl.CostEstimate(
            flops=3 * N * D, transcendentals=0,
            bytes_accessed=2 * N * D * 4 + D * 4),
    )(true_relevance, predicted_relevance)
    return out.reshape(D)  # torch.sum(..., dim=0) of (N, D) -> (D,)


if __name__ == "__main__":
    key = jax.random.PRNGKey(0)
    k1, k2, k3, k4 = jax.random.split(key, 4)

    # Pure-JAX reference of PointWiseLoss.forward semantics.
    def ref(t, p, reduction):
        lv = (t - p) ** 2
        if reduction == "none":
            return lv
        s = jnp.sum(lv, axis=0)
        return s / t.shape[0] if reduction == "mean" else s

    ok = True

    # Small aligned case: 16 samples x 128 scores.
    N, D = 16, 128
    true_rel = jax.random.normal(k1, (N, D), dtype=jnp.float32)
    pred_rel = jax.random.normal(k2, (N, D), dtype=jnp.float32)
    for red in ("mean", "sum", "none"):
        out = jax.block_until_ready(point_wise_loss(true_rel, pred_rel,
                                                    reduction=red))
        expected = ref(true_rel, pred_rel, red)
        if not jnp.allclose(out, expected, atol=1e-5, rtol=1e-5):
            ok = False
            print(f"MISMATCH for reduction={red} (aligned case)")

    # Ragged case: N not a multiple of block_rows (exercises the tail mask).
    N2, D2 = 20, 128
    true_r2 = jax.random.normal(k3, (N2, D2), dtype=jnp.float32)
    pred_r2 = jax.random.normal(k4, (N2, D2), dtype=jnp.float32)
    for red in ("mean", "sum"):
        out = jax.block_until_ready(point_wise_loss(true_r2, pred_r2,
                                                    reduction=red,
                                                    block_rows=8))
        expected = ref(true_r2, pred_r2, red)
        if not jnp.allclose(out, expected, atol=1e-5, rtol=1e-5):
            ok = False
            print(f"MISMATCH for reduction={red} (ragged case)")

    if ok:
        print("KERNEL_OK")
</pallas_src>

<mosaic_0001>
module attributes {stable_mosaic.version = 11 : i64} {
  func.func @_pointwise_reduce_kernel(%arg0: i32, %arg1: i32, %arg2: memref<16x128xf32, #tpu.memory_space<vmem>>, %arg3: memref<16x128xf32, #tpu.memory_space<vmem>>, %arg4: memref<1x128xf32, #tpu.memory_space<vmem>>, %arg5: memref<8x128xf32, #tpu.memory_space<vmem>>) attributes {dimension_semantics = [#tpu.dimension_semantics<parallel>, #tpu.dimension_semantics<arbitrary>], iteration_bounds = array<i64: 1, 1>, scalar_prefetch = 0 : i64, scratch_operands = 1 : i64, tpu.core_type = #tpu.core_type<tc>, window_params = [{transform_indices = @transform_0, window_bounds = array<i64: 16, 128>}, {transform_indices = @transform_1, window_bounds = array<i64: 16, 128>}, {transform_indices = @transform_2, window_bounds = array<i64: 1, 128>}]} {
    %c0_i32 = arith.constant 0 : i32
    %0 = arith.cmpi eq, %arg1, %c0_i32 : i32
    %1 = arith.extui %0 : i1 to i32
    %c0_i32_0 = arith.constant 0 : i32
    %2 = arith.cmpi ne, %1, %c0_i32_0 : i32
    scf.if %2 {
      %cst_10 = arith.constant 0.000000e+00 : f32
      %15 = vector.broadcast %cst_10 : f32 to vector<8x128xf32>
      %c0_11 = arith.constant 0 : index
      %c0_12 = arith.constant 0 : index
      %16 = vector.load %arg5[%c0_11, %c0_12] : memref<8x128xf32, #tpu.memory_space<vmem>>, vector<8x128xf32>
      tpu.vector_store %arg5[%c0_11, %c0_12], %15 {strides = array<i32>} : memref<8x128xf32, #tpu.memory_space<vmem>>, vector<8x128xf32>,
    } else {
    }
    %c0 = arith.constant 0 : index
    %c0_1 = arith.constant 0 : index
    %3 = vector.load %arg2[%c0, %c0_1] : memref<16x128xf32, #tpu.memory_space<vmem>>, vector<16x128xf32>
    %c0_2 = arith.constant 0 : index
    %c0_3 = arith.constant 0 : index
    %4 = vector.load %arg3[%c0_2, %c0_3] : memref<16x128xf32, #tpu.memory_space<vmem>>, vector<16x128xf32>
    %5 = arith.subf %3, %4 : vector<16x128xf32>
    %6 = arith.mulf %5, %5 : vector<16x128xf32>
    %c0_4 = arith.constant 0 : index
    %c0_5 = arith.constant 0 : index
    %7 = vector.load %arg5[%c0_4, %c0_5] : memref<8x128xf32, #tpu.memory_space<vmem>>, vector<8x128xf32>
    %8 = vector.shape_cast %6 : vector<16x128xf32> to vector<2x8x128xf32>
    %cst = arith.constant dense<0.000000e+00> : vector<8x128xf32>
    %9 = vector.multi_reduction <add>, %8, %cst [0] : vector<2x8x128xf32> to vector<8x128xf32>
    %10 = arith.addf %7, %9 : vector<8x128xf32>
    %c0_6 = arith.constant 0 : index
    %c0_7 = arith.constant 0 : index
    %11 = vector.load %arg5[%c0_6, %c0_7] : memref<8x128xf32, #tpu.memory_space<vmem>>, vector<8x128xf32>
    tpu.vector_store %arg5[%c0_6, %c0_7], %10 {strides = array<i32>} : memref<8x128xf32, #tpu.memory_space<vmem>>, vector<8x128xf32>,
    %c0_i32_8 = arith.constant 0 : i32
    %12 = arith.cmpi eq, %arg1, %c0_i32_8 : i32
    %13 = arith.extui %12 : i1 to i32
    %c0_i32_9 = arith.constant 0 : i32
    %14 = arith.cmpi ne, %13, %c0_i32_9 : i32
    scf.if %14 {
      %c0_10 = arith.constant 0 : index
      %c0_11 = arith.constant 0 : index
      %15 = vector.load %arg5[%c0_10, %c0_11] : memref<8x128xf32, #tpu.memory_space<vmem>>, vector<8x128xf32>
      %cst_12 = arith.constant dense<0.000000e+00> : vector<128xf32>
      %16 = vector.multi_reduction <add>, %15, %cst_12 [0] : vector<8x128xf32> to vector<128xf32>
      %17 = vector.shape_cast %16 : vector<128xf32> to vector<1x128xf32>
      %cst_13 = arith.constant 6.250000e-02 : f32
      %18 = vector.broadcast %cst_13 : f32 to vector<1x128xf32>
      %19 = arith.mulf %17, %18 : vector<1x128xf32>
      %c0_14 = arith.constant 0 : index
      %c0_15 = arith.constant 0 : index
      %20 = vector.load %arg4[%c0_14, %c0_15] : memref<1x128xf32, #tpu.memory_space<vmem>>, vector<1x128xf32>
      tpu.vector_store %arg4[%c0_14, %c0_15], %19 {strides = array<i32>} : memref<1x128xf32, #tpu.memory_space<vmem>>, vector<1x128xf32>,
    } else {
    }
    return
  }
  func.func @transform_0(%arg0: i32, %arg1: i32) -> (i32, i32) {
    %c0_i32 = arith.constant 0 : i32
    return %arg1, %arg0 : i32, i32
  }
  func.func @transform_1(%arg0: i32, %arg1: i32) -> (i32, i32) {
    %c0_i32 = arith.constant 0 : i32
    return %arg1, %arg0 : i32, i32
  }
  func.func @transform_2(%arg0: i32, %arg1: i32) -> (i32, i32) {
    %c0_i32 = arith.constant 0 : i32
    %c0_i32_0 = arith.constant 0 : i32
    return %c0_i32, %arg0 : i32, i32
  }
}

</mosaic_0001>

<bundles_post_ra>
// kernel: tpu_custom_call.1
= control target key start
LH: loop header
LB: loop body
LE: loop exit
PB: predicated region body
PF: predicated region fallthrough
CT: control target
= control target key end

     0   :  { %7 = vsyncpa [#allocation4], 0  ;;  %s203_s0 = inlined_call_operand.hbm [shape: f32[16,128], index: 0, kind: input, shape index: {}]   ;;  %s204_s1 = inlined_call_operand.hbm [shape: f32[16,128], index: 1, kind: input, shape index: {}]   ;;  %s205_s2 = inlined_call_operand.hbm [shape: f32[1,128], index: 2, kind: output, shape index: {}]  }
   0x1   :  { %8 = vsyncpa [#allocation7], 0 }
   0x2   :  { %9 = vsyncpa [#allocation5], 0  ;;  %s14_s11 = sshll.u32 %s203_s0, 4  ;;  %s174_s12 = smov [#allocation3]   ;;  %s15_s11 = int_to_ptr.hbm [resolvable:$true] %s14_s11 }
   0x3   :  { %s16_s13 = sshll.u32 %s174_s12, 4  ;;  %s27_s16 = sshll.u32 %s204_s1, 4  ;;  %s17_s13 = int_to_ptr.vmem [resolvable:$true] %s16_s13  ;;  %s28_s16 = int_to_ptr.hbm [resolvable:$true] %s27_s16 }
   0x4   :  { %s175_s17 = smov 128   ;;  %s176_s18 = smov 8  }
   0x5   :  { %22 = dma.hbm_to_vmem [thread:$0]  %s15_s11, 256, %s17_s13, [#allocation4], %s175_s17, %s175_s17, %s176_s18  }
   0x6   :  { %s177_s19 = smov [#allocation6]  }
   0x7   :  { %s29_s20 = sshll.u32 %s177_s19, 4  ;;  %s30_s20 = int_to_ptr.vmem [resolvable:$true] %s29_s20 }
   0x8   :  { %35 = dma.hbm_to_vmem [thread:$0]  %s28_s16, 256, %s30_s20, [#allocation7], %s175_s17, %s175_s17, %s176_s18  }
   0x9   :  { %168 = dma.done.wait [#allocation4], 256  }
   0xa   :  { %169 = vsyncadd [#allocation4], 4294967040 }
   0xb   :  { %170 = dma.done.wait [#allocation7], 256  }
   0xc   :  { %171 = vsyncadd [#allocation7], 4294967040  ;;  %v49_v0 = vld [vmem:[#allocation3] sm:$0xff]  ;;  %v50_v1 = vld [vmem:[#allocation3 + $0x8] sm:$0xff]  ;;  %s178_s0 = smov [#allocation8]   ;;  %s80_s23 = sshll.u32 %s205_s2, 4  ;;  %s81_s23 = int_to_ptr.hbm [resolvable:$true] %s80_s23 }
   0xd   :  { %v51_v2 = vld [vmem:[#allocation6] sm:$0xff]  ;;  %v52_v3 = vld [vmem:[#allocation6 + $0x8] sm:$0xff]  ;;  %s78_s1 = sshll.u32 %s178_s0, 4  ;;  %s79_s1 = int_to_ptr.vmem [resolvable:$true] %s78_s1 }
   0xe   :  { %v53_v4 = vsub.f32 %v49_v0, %v51_v2  ;;  %v54_v5 = vsub.f32 %v50_v1, %v52_v3 }
  0x10   :  { %v55_v6 = vmul.f32 %v53_v4, %v53_v4  ;;  %v56_v7 = vmul.f32 %v54_v5, %v54_v5 }
  0x12   :  { %v58_v8 = vadd.f32 %v56_v7, %v55_v6 }
  0x14   :  { %v65_v9 = vrot.slane %v58_v8, 4 }
  0x16   :  { %v66_v10 = vadd.f32 %v65_v9, %v58_v8 }
  0x18   :  { %v67_v11 = vrot.slane %v66_v10, 2 }
  0x1a   :  { %v68_v12 = vadd.f32 %v67_v11, %v66_v10 }
  0x1c   :  { %v69_v13 = vrot.slane %v68_v12, 1 }
  0x1e   :  { %v70_v14 = vadd.f32 %v69_v13, %v68_v12 }
  0x20   :  { %v71_v15 = vmul.f32 0.0625, %v70_v14 }
  0x22   :  { %72 = vst [vmem:[#allocation8] sm:$0x1] %v71_v15 }
  0x23   :  { %83 = dma.vmem_to_hbm [thread:$0]  %s79_s1, 16, %s81_s23, [#allocation5]  }
  0x24   :  { %172 = dma.done.wait [#allocation5], 16  }
  0x25   :  { %173 = vsyncadd [#allocation5], 4294967280 }
  0x26   :  { %88 = vsyncpa [#allocation4], 1 }
  0x27   :  { %89 = vsyncpa [#allocation7], 1 }
  0x28   :  { %90 = vsyncpa [#allocation5], 1 }

</bundles_post_ra>
